<compile_context>
chip_gen: v7x
topology: tpu7x:2x2x1
jax: 0.10.0
libtpu: 0.0.40
codegen_flags: <defaults>
</compile_context>

<pallas_src>
import math

import jax
import jax.numpy as jnp
from jax.experimental import pallas as pl
from jax.experimental.pallas import tpu as pltpu


def make_positional_encoding_table(d_model, max_len=500, dtype=jnp.float32):
    """Same values as the PyTorch module's `pe` buffer, shape (max_len, d_model)."""
    position = jnp.arange(max_len, dtype=jnp.float32)[:, None]            # (max_len, 1)
    div_term = jnp.exp(
        jnp.arange(0, d_model, 2, dtype=jnp.float32) * (-math.log(10000.0) / d_model)
    )                                                                      # (d_model//2,)
    ang = position * div_term                                              # (max_len, d_model//2)
    pe = jnp.zeros((max_len, d_model), jnp.float32)
    pe = pe.at[:, 0::2].set(jnp.sin(ang))
    pe = pe.at[:, 1::2].set(jnp.cos(ang))
    return pe.astype(dtype)


def _pe_add_kernel(x_ref, pe_ref, o_ref):
    # x_ref/o_ref: (tile_b, tile_s, D);  pe_ref: (tile_s, D), broadcast over batch.
    o_ref[...] = x_ref[...] + pe_ref[...][None, :, :]


def positional_encoding_forward(x, pe, *, tile_b=None, tile_s=None):
    """x: (B, S, D); pe: (max_len, D) with max_len >= S. Returns x + pe[:S]."""
    B, S, D = x.shape
    assert pe.shape[0] >= S and pe.shape[1] == D
    pe_s = pe[:S].astype(x.dtype)  # (S, D) — cheap XLA slice outside the kernel

    itemsize = jnp.dtype(x.dtype).itemsize
    # Big tiles amortize the ~0.35 us per-grid-step overhead; the op is purely
    # memory bound so the only constraint is VMEM (double-buffered x-in + out
    # + pe).  Cap each x block at ~2 MiB, comfortably under the default scoped
    # VMEM limit on every generation (v5e/v6e/v7x).
    if tile_s is None:
        tile_s = S if S <= 512 else 512          # full dim, or 8-aligned chunk
    if tile_b is None:
        budget_rows = max(1, (2 * 1024 * 1024) // (tile_s * D * itemsize))
        tile_b = min(B, budget_rows)

    n_s = pl.cdiv(S, tile_s)                     # ragged S handled by Pallas padding
    n_b = pl.cdiv(B, tile_b)                     # ragged B handled by Pallas padding

    cost = pl.CostEstimate(
        flops=B * S * D,                         # one add per element
        transcendentals=0,
        bytes_accessed=(2 * B * S * D + S * D) * itemsize,
    )

    return pl.pallas_call(
        _pe_add_kernel,
        # seq outer / batch inner so the pe block stays resident across the
        # inner batch loop.
        grid=(n_s, n_b),
        in_specs=[
            pl.BlockSpec((tile_b, tile_s, D), lambda s, b: (b, s, 0)),
            pl.BlockSpec((tile_s, D), lambda s, b: (s, 0)),
        ],
        out_specs=pl.BlockSpec((tile_b, tile_s, D), lambda s, b: (b, s, 0)),
        out_shape=jax.ShapeDtypeStruct((B, S, D), x.dtype),
        compiler_params=pltpu.CompilerParams(
            dimension_semantics=("parallel", "parallel"),
        ),
        cost_estimate=cost,
    )(x, pe_s)


if __name__ == "__main__":
    D_MODEL, MAX_LEN = 32, 500
    pe = make_positional_encoding_table(D_MODEL, MAX_LEN)

    key = jax.random.PRNGKey(0)
    k1, k2 = jax.random.split(key)

    # Small, evenly-tiled case: x (batch=2, seq=8, d_model=32).
    B, S = 2, 8
    x = jax.random.normal(k1, (B, S, D_MODEL), jnp.float32)
    out = positional_encoding_forward(x, pe)
    jax.block_until_ready(out)
    ref = x + pe[None, :S, :]
    assert out.shape == x.shape
    assert jnp.allclose(out, ref, atol=1e-6), "positional-encoding add mismatch"

    # Ragged case exercising pl.cdiv tiling (tiles don't divide B or S evenly).
    B2, S2 = 3, 12
    x2 = jax.random.normal(k2, (B2, S2, D_MODEL), jnp.float32)
    out2 = positional_encoding_forward(x2, pe, tile_b=2, tile_s=8)
    jax.block_until_ready(out2)
    ref2 = x2 + pe[None, :S2, :]
    assert jnp.allclose(out2, ref2, atol=1e-6), "ragged-tile mismatch"

    print("KERNEL_OK")
</pallas_src>

<mosaic_0001>
module attributes {stable_mosaic.version = 11 : i64} {
  func.func @_pe_add_kernel(%arg0: i32, %arg1: i32, %arg2: memref<2x8x32xf32, #tpu.memory_space<vmem>>, %arg3: memref<8x32xf32, #tpu.memory_space<vmem>>, %arg4: memref<2x8x32xf32, #tpu.memory_space<vmem>>) attributes {dimension_semantics = [#tpu.dimension_semantics<parallel>, #tpu.dimension_semantics<parallel>], iteration_bounds = array<i64: 1, 1>, scalar_prefetch = 0 : i64, scratch_operands = 0 : i64, tpu.core_type = #tpu.core_type<tc>, window_params = [{transform_indices = @transform_0, window_bounds = array<i64: 2, 8, 32>}, {transform_indices = @transform_1, window_bounds = array<i64: 8, 32>}, {transform_indices = @transform_2, window_bounds = array<i64: 2, 8, 32>}]} {
    %c0 = arith.constant 0 : index
    %c0_0 = arith.constant 0 : index
    %c0_1 = arith.constant 0 : index
    %0 = vector.load %arg2[%c0, %c0_0, %c0_1] : memref<2x8x32xf32, #tpu.memory_space<vmem>>, vector<2x8x32xf32>
    %c0_2 = arith.constant 0 : index
    %c0_3 = arith.constant 0 : index
    %1 = vector.load %arg3[%c0_2, %c0_3] : memref<8x32xf32, #tpu.memory_space<vmem>>, vector<8x32xf32>
    %2 = vector.shape_cast %1 : vector<8x32xf32> to vector<1x8x32xf32>
    %3 = vector.broadcast %2 : vector<1x8x32xf32> to vector<2x8x32xf32>
    %4 = arith.addf %0, %3 : vector<2x8x32xf32>
    %c0_4 = arith.constant 0 : index
    %c0_5 = arith.constant 0 : index
    %c0_6 = arith.constant 0 : index
    %5 = vector.load %arg4[%c0_4, %c0_5, %c0_6] : memref<2x8x32xf32, #tpu.memory_space<vmem>>, vector<2x8x32xf32>
    tpu.vector_store %arg4[%c0_4, %c0_5, %c0_6], %4 {strides = array<i32>} : memref<2x8x32xf32, #tpu.memory_space<vmem>>, vector<2x8x32xf32>,
    return
  }
  func.func @transform_0(%arg0: i32, %arg1: i32) -> (i32, i32, i32) {
    %c0_i32 = arith.constant 0 : i32
    %c0_i32_0 = arith.constant 0 : i32
    return %arg1, %arg0, %c0_i32 : i32, i32, i32
  }
  func.func @transform_1(%arg0: i32, %arg1: i32) -> (i32, i32) {
    %c0_i32 = arith.constant 0 : i32
    %c0_i32_0 = arith.constant 0 : i32
    return %arg0, %c0_i32 : i32, i32
  }
  func.func @transform_2(%arg0: i32, %arg1: i32) -> (i32, i32, i32) {
    %c0_i32 = arith.constant 0 : i32
    %c0_i32_0 = arith.constant 0 : i32
    return %arg1, %arg0, %c0_i32 : i32, i32, i32
  }
}

</mosaic_0001>

<bundles_post_ra>
// kernel: tpu_custom_call.1
= control target key start
LH: loop header
LB: loop body
LE: loop exit
PB: predicated region body
PF: predicated region fallthrough
CT: control target
= control target key end

     0   :  { %7 = vsyncpa [#allocation3], 0  ;;  %s203_s0 = inlined_call_operand.hbm [shape: f32[2,8,32], index: 0, kind: input, shape index: {}]   ;;  %s204_s1 = inlined_call_operand.hbm [shape: f32[8,32], index: 1, kind: input, shape index: {}]   ;;  %s205_s2 = inlined_call_operand.hbm [shape: f32[2,8,32], index: 2, kind: output, shape index: {}]  }
   0x1   :  { %8 = vsyncpa [#allocation6], 0 }
   0x2   :  { %9 = vsyncpa [#allocation4], 0  ;;  %s141_s9 = smov [#allocation2]   ;;  %s69_s13 = scalar_lea.hbm %s203_s0, 256 }
   0x3   :  { %s15_s10 = sshll.u32 %s141_s9, 4  ;;  %p70_p0 = scmp.ne.s32.totalorder %s203_s0, %s69_s13  ;;  %s16_s10 = int_to_ptr.vmem [resolvable:$true] %s15_s10 }
   0x4   :  { %p73_p1 = scmp.lt.u32.totalorder %s69_s13, %s203_s0 }
   0x6   :  { %p75_p2 = pnand %p73_p1, %p70_p0 }
   0x8   :  { %78 = shalt.err (!%p75_p2)
}
   0x9   :  { %s79_s18 = scalar_lea.vmem %s16_s10, 256  ;;  %p84_p4 = scmp.lt.s32.totalorder %s16_s10, %s16_s10 }
   0xa   :  { %p80_p3 = scmp.ne.s32.totalorder %s16_s10, %s79_s18  ;;  %p85_p5 = scmp.lt.s32.totalorder %s79_s18, %s79_s18 }
   0xc   :  { %p86_p6 = por %p85_p5, %p84_p4 }
   0xe   :  { %p87_p7 = pnand %p86_p6, %p80_p3 }
  0x10   :  { %90 = shalt.err (!%p87_p7)
}
  0x11   :  { %s142_s19 = smov 128   ;;  %s143_s20 = smov 8  }
  0x12   :  { %21 = dma.hbm_to_vmem [thread:$0]  %s203_s0, 256, %s16_s10, [#allocation3], %s142_s19, %s142_s19, %s143_s20  }
  0x13   :  { %s144_s23 = smov [#allocation5]   ;;  %s91_s27 = scalar_lea.hbm %s204_s1, 128 }
  0x14   :  { %s28_s24 = sshll.u32 %s144_s23, 4  ;;  %p92_p8 = scmp.ne.s32.totalorder %s204_s1, %s91_s27  ;;  %s29_s24 = int_to_ptr.vmem [resolvable:$true] %s28_s24 }
  0x15   :  { %p95_p9 = scmp.lt.u32.totalorder %s91_s27, %s204_s1 }
  0x17   :  { %p97_p10 = pnand %p95_p9, %p92_p8 }
  0x19   :  { %100 = shalt.err (!%p97_p10)
}
  0x1a   :  { %s101_s4 = scalar_lea.vmem %s29_s24, 128  ;;  %p106_p12 = scmp.lt.s32.totalorder %s29_s24, %s29_s24 }
  0x1b   :  { %p102_p11 = scmp.ne.s32.totalorder %s29_s24, %s101_s4  ;;  %p107_p13 = scmp.lt.s32.totalorder %s101_s4, %s101_s4 }
  0x1d   :  { %p108_p0 = por %p107_p13, %p106_p12 }
  0x1f   :  { %p109_p1 = pnand %p108_p0, %p102_p11 }
  0x21   :  { %112 = shalt.err (!%p109_p1)
}
  0x22   :  { %31 = dma.hbm_to_vmem [thread:$0]  %s204_s1, 128, %s29_s24, [#allocation6]  }
  0x23   :  { %135 = dma.done.wait [#allocation3], 256  }
  0x24   :  { %136 = vsyncadd [#allocation3], 4294967040 }
  0x25   :  { %137 = dma.done.wait [#allocation6], 128  }
  0x26   :  { %138 = vsyncadd [#allocation6], 4294967168  ;;  %s145_s6 = smov [#allocation7]   ;;  %v38_v0 = vld [vmem:[#allocation2] sm:$0xff]  ;;  %v40_v1 = vld [vmem:[#allocation5] sm:$0xff]  ;;  %vm43_vm0 = vcmask 261120  }
  0x27   :  { %s51_s7 = sshll.u32 %s145_s6, 4  ;;  %v39_v2 = vld [vmem:[#allocation2 + $0x8] sm:$0xff]  ;;  %v41_v3 = vadd.f32 %v40_v1, %v38_v0  ;;  %s52_s7 = int_to_ptr.vmem [resolvable:$true] %s51_s7 }
  0x28   :  { %v42_v4 = vadd.f32 %v40_v1, %v39_v2  ;;  %s113_s8 = scalar_lea.vmem %s52_s7, 256  ;;  %p118_p3 = scmp.lt.s32.totalorder %s52_s7, %s52_s7 }
  0x29   :  { %44 = vst.msk [vmem:[#allocation7] sm:$0xff] %vm43_vm0, %v41_v3  ;;  %p114_p2 = scmp.ne.s32.totalorder %s52_s7, %s113_s8  ;;  %p119_p4 = scmp.lt.s32.totalorder %s113_s8, %s113_s8 }
  0x2a   :  { %45 = vst.msk [vmem:[#allocation7 + $0x8] sm:$0xff] %vm43_vm0, %v42_v4 }
  0x2b   :  { %p120_p5 = por %p119_p4, %p118_p3 }
  0x2d   :  { %p121_p6 = pnand %p120_p5, %p114_p2 }
  0x2f   :  { %124 = shalt.err (!%p121_p6)
}
  0x30   :  { %s125_s10 = scalar_lea.hbm %s205_s2, 256 }
  0x31   :  { %p126_p7 = scmp.ne.s32.totalorder %s205_s2, %s125_s10  ;;  %p129_p8 = scmp.lt.u32.totalorder %s125_s10, %s205_s2 }
  0x33   :  { %p131_p9 = pnand %p129_p8, %p126_p7 }
  0x35   :  { %134 = shalt.err (!%p131_p9)
}
  0x36   :  { %57 = dma.vmem_to_hbm [thread:$0]  %s52_s7, 256, %s205_s2, [#allocation4], %s142_s19, %s142_s19, %s143_s20  }
  0x37   :  { %139 = dma.done.wait [#allocation4], 256  }
  0x38   :  { %140 = vsyncadd [#allocation4], 4294967040 }
  0x39   :  { %61 = vsyncpa [#allocation3], 1 }
  0x3a   :  { %62 = vsyncpa [#allocation6], 1 }
  0x3b   :  { %63 = vsyncpa [#allocation4], 1 }

</bundles_post_ra>
